<compile_context>
chip_gen: v5e
topology: v5e:2x2
jax: 0.10.0
libtpu: 0.0.40
codegen_flags: <defaults>
</compile_context>

<pallas_src>
import functools
import math
import numpy as np
import jax
import jax.numpy as jnp
from jax.experimental import pallas as pl
from jax.experimental.pallas import tpu as pltpu


def _round_up(x, m):
    return ((x + m - 1) // m) * m


def _global_agg_kernel(sv_ref, ev_ref, nv_ref, w1_ref, w2t_ref, w3a_ref, w3b_ref,
                       out_ref, *, valid_k):
    f32 = jnp.float32
    TM, D = sv_ref.shape
    MK, Da = nv_ref.shape          # MK = TM * Kp, Da = D + 1 (nw folded as col D)
    K = MK // TM                   # padded K (multiple of 8)

    nv = nv_ref[...]               # (TM*K, D+1) streaming dtype — no full upcast
    ev = ev_ref[...]               # (TM*K, D+1) streaming dtype, rows repeated K
                                   #            times, last column == 1

    # cat([extra*nbr, nw], -1) @ w_1 : one MXU pass, low-precision operands,
    # f32 accumulation.
    prod = ev * nv                                                    # (TM*K, D+1)
    h = jnp.dot(prod, w1_ref[...], preferred_element_type=f32)        # (TM*K, D) f32
    h = jnp.where(h > 0, h, 0.2 * h)                                  # leaky_relu(0.2)

    # attention scores: lane-reduce against w_2^T  -> (TM*K, 1) f32
    a = jnp.sum(h * w2t_ref[...], axis=-1, keepdims=True)
    a3 = a.reshape(TM, K, 1)                       # free view (f32, K % 8 == 0)
    if valid_k < K:                                # static branch: mask padded K
        kidx = jax.lax.broadcasted_iota(jnp.int32, (TM, K, 1), 1)
        a3 = jnp.where(kidx < valid_k, a3, -jnp.inf)

    # softmax over K; normalization deferred until after aggregation (EUP recip).
    a_max = jnp.max(a3, axis=1, keepdims=True)     # (TM, 1, 1)
    e = jnp.exp(a3 - a_max)                        # (TM, K, 1) f32

    # aggregation: neighbor slab stays in its streaming dtype, promoted per-vreg.
    weighted = e.reshape(MK, 1) * nv[:, :D]            # (TM*K, D) f32
    agg = jnp.sum(weighted.reshape(TM, K, D), axis=1)  # (TM, D) f32
    denom = jnp.sum(e, axis=1)                          # (TM, 1)
    agg = agg * pl.reciprocal(denom, approx=True)

    # cat([self, agg], -1) @ w_3  ==  self @ w_3[:D] + agg @ w_3[D:]
    out = (jnp.dot(sv_ref[...], w3a_ref[...], preferred_element_type=f32)
           + jnp.dot(agg.astype(w3b_ref.dtype), w3b_ref[...],
                     preferred_element_type=f32))
    out_ref[...] = jnp.maximum(out, 0.0).astype(out_ref.dtype)


def global_aggregator(self_vectors, neighbor_vector, batch_size, masks,
                      neighbor_weight, extra_vector, w1, w2, w3,
                      *, tm=512, out_dtype=None):
    """Pallas implementation of GlobalAggregator.forward (extra_vector path).

    tm=512 keeps the per-step footprint well under v7x's 64 MiB VMEM; on
    v5e/v6e (128 MiB) tm=1024-2048 with vmem_limit ~96 MiB is also fine.
    """
    del masks  # unused by the PyTorch forward
    B, n, K, D = neighbor_vector.shape
    M = B * n
    in_dtype = neighbor_vector.dtype
    out_dtype = out_dtype or in_dtype

    sv = self_vectors.reshape(M, D).astype(in_dtype)
    ev = extra_vector.reshape(M, D).astype(in_dtype)
    nv = neighbor_vector.reshape(M, K, D)
    nw = neighbor_weight.reshape(M, K).astype(in_dtype)

    # Fold neighbor_weight into the w_1 contraction: append it as feature D of
    # the neighbor slab and append a ones-column to extra_vector, so
    # cat([ev*nv, nw], -1) == (ev_aug * nv_aug) and the projection is one
    # (D+1)-deep matmul.
    Da = D + 1
    nv_aug = jnp.concatenate([nv, nw[..., None]], axis=-1)            # (M, K, D+1)
    ev_aug = jnp.concatenate([ev, jnp.ones((M, 1), in_dtype)], axis=-1)  # (M, D+1)

    # Pad K to a sublane multiple so in-kernel f32 (TM*K, .) <-> (TM, K, .)
    # reshapes are free views. Zero-padded neighbors are masked with -inf scores.
    Kp = _round_up(K, 8)
    if Kp != K:
        nv_aug = jnp.pad(nv_aug, ((0, 0), (0, Kp - K), (0, 0)))

    # Row tiling. Guarantee >= 2 grid steps whenever possible so the "parallel"
    # axis can feed both v7x TensorCores; padded rows are harmless (all-zero
    # inputs give a finite softmax and a zero output row) and sliced off.
    M8 = _round_up(M, 8)
    tm = _round_up(min(tm, M8), 8)
    if M8 // tm < 2 and M8 >= 16:
        tm = _round_up((M8 + 1) // 2, 8)
    Mp = _round_up(M8, tm)
    if Mp != M:
        sv = jnp.pad(sv, ((0, Mp - M), (0, 0)))
        ev_aug = jnp.pad(ev_aug, ((0, Mp - M), (0, 0)))
        nv_aug = jnp.pad(nv_aug, ((0, Mp - M), (0, 0), (0, 0)))

    # Flatten the neighbor slab and broadcast extra_vector to the same flat row
    # layout (row t*Kp + k). Everything the kernel touches is then a plain
    # lane-major 2-D block — no low-precision 3-D relayouts in-kernel.
    nv_flat = nv_aug.reshape(Mp * Kp, Da)
    ev_rep = jnp.broadcast_to(ev_aug[:, None, :], (Mp, Kp, Da)).reshape(Mp * Kp, Da)

    # Weights: MXU operands in the streaming dtype (bf16 in the demo) so the
    # matmuls are single-pass; accumulation stays f32 via preferred_element_type.
    # w2 stays f32 (it feeds a VPU lane-reduce, not the MXU).
    w1_c = w1.astype(in_dtype)                   # (D+1, D)
    w2t = w2.astype(jnp.float32).reshape(1, D)   # (1, D)  (= w_2^T)
    w3a = w3[:D, :].astype(in_dtype)             # (D, D)
    w3b = w3[D:, :].astype(in_dtype)             # (D, D)

    kernel = functools.partial(_global_agg_kernel, valid_k=K)

    out = pl.pallas_call(
        kernel,
        out_shape=jax.ShapeDtypeStruct((Mp, D), out_dtype),
        grid_spec=pltpu.PrefetchScalarGridSpec(
            num_scalar_prefetch=0,
            grid=(Mp // tm,),
            in_specs=[
                pl.BlockSpec((tm, D), lambda i: (i, 0)),        # self_vectors
                pl.BlockSpec((tm * Kp, Da), lambda i: (i, 0)),  # extra (repeated, +ones col)
                pl.BlockSpec((tm * Kp, Da), lambda i: (i, 0)),  # neighbors (+nw col)
                pl.BlockSpec((Da, D), lambda i: (0, 0)),        # w1 (full D+1 x D)
                pl.BlockSpec((1, D), lambda i: (0, 0)),         # w2^T
                pl.BlockSpec((D, D), lambda i: (0, 0)),         # w3[:D]
                pl.BlockSpec((D, D), lambda i: (0, 0)),         # w3[D:]
            ],
            out_specs=pl.BlockSpec((tm, D), lambda i: (i, 0)),
        ),
        compiler_params=pltpu.CompilerParams(
            dimension_semantics=("parallel",),        # shards steps across v7x's 2 TCs
            vmem_limit_bytes=48 * 1024 * 1024,        # headroom under v7x's 64 MiB
        ),
    )(sv, ev_rep, nv_flat, w1_c, w2t, w3a, w3b)

    return out[:M].reshape(batch_size, -1, D)


def _reference(sv, nv, nw, ev, w1, w2, w3):
    prod = ev[:, :, None, :] * nv
    cat = jnp.concatenate([prod, nw[..., None]], axis=-1)
    alpha = jnp.einsum('bnkf,fd->bnkd', cat, w1)
    alpha = jax.nn.leaky_relu(alpha, negative_slope=0.2)
    alpha = jnp.einsum('bnkd,do->bnk', alpha, w2)
    alpha = jax.nn.softmax(alpha, axis=-1)[..., None]
    nbr = jnp.sum(alpha * nv, axis=-2)
    out = jnp.concatenate([sv, nbr], axis=-1) @ w3
    return jnp.maximum(out, 0.0)


if __name__ == "__main__":
    B, n, K, D = 2, 8, 8, 32   # batch, session nodes, neighbors, hidden dim

    key = jax.random.PRNGKey(0)
    ks = jax.random.split(key, 8)
    stdv = 1.0 / math.sqrt(D)

    # deterministic synthetic parameters (shapes from __init__)
    w1 = jax.random.uniform(ks[0], (D + 1, D), jnp.float32, -stdv, stdv)
    w2 = jax.random.uniform(ks[1], (D, 1), jnp.float32, -stdv, stdv)
    w3 = jax.random.uniform(ks[2], (2 * D, D), jnp.float32, -stdv, stdv)
    # bias (D,) is declared in __init__ but unused by forward -> omitted.

    # activations stream in bf16 (native dtype) — half the HBM traffic, bf16 MXU.
    self_vectors = jax.random.normal(ks[3], (B, n, D), jnp.float32).astype(jnp.bfloat16)
    neighbor_vector = jax.random.normal(ks[4], (B, n, K, D), jnp.float32).astype(jnp.bfloat16)
    neighbor_weight = jax.random.normal(ks[5], (B, n, K), jnp.float32).astype(jnp.bfloat16)
    extra_vector = jax.random.normal(ks[6], (B, n, D), jnp.float32).astype(jnp.bfloat16)
    masks = jnp.ones((B, n, K), jnp.bfloat16)  # unused by forward

    out = global_aggregator(self_vectors, neighbor_vector, B, masks,
                            neighbor_weight, extra_vector, w1, w2, w3)
    out = jax.block_until_ready(out)

    # f32 reference on the same bf16-quantized inputs (kernel uses bf16 MXU
    # operands + approx reciprocal, so tolerance is a few percent).
    ref = _reference(self_vectors.astype(jnp.float32),
                     neighbor_vector.astype(jnp.float32),
                     neighbor_weight.astype(jnp.float32),
                     extra_vector.astype(jnp.float32),
                     w1, w2, w3)
    np.testing.assert_allclose(np.asarray(out.astype(jnp.float32)),
                               np.asarray(ref), rtol=4e-2, atol=4e-2)
    print("KERNEL_OK")
</pallas_src>

<mosaic_0001>
module attributes {stable_mosaic.version = 11 : i64} {
  func.func @_global_agg_kernel(%arg0: i32, %arg1: memref<8x32xbf16, #tpu.memory_space<vmem>>, %arg2: memref<64x33xbf16, #tpu.memory_space<vmem>>, %arg3: memref<64x33xbf16, #tpu.memory_space<vmem>>, %arg4: memref<33x32xbf16, #tpu.memory_space<vmem>>, %arg5: memref<1x32xf32, #tpu.memory_space<vmem>>, %arg6: memref<32x32xbf16, #tpu.memory_space<vmem>>, %arg7: memref<32x32xbf16, #tpu.memory_space<vmem>>, %arg8: memref<8x32xbf16, #tpu.memory_space<vmem>>) attributes {dimension_semantics = [#tpu.dimension_semantics<parallel>], iteration_bounds = array<i64: 2>, scalar_prefetch = 0 : i64, scratch_operands = 0 : i64, tpu.core_type = #tpu.core_type<tc>, window_params = [{transform_indices = @transform_0, window_bounds = array<i64: 8, 32>}, {transform_indices = @transform_1, window_bounds = array<i64: 64, 33>}, {transform_indices = @transform_2, window_bounds = array<i64: 64, 33>}, {pipeline_mode = #tpu.pipeline_mode<synchronous>, transform_indices = @transform_3, window_bounds = array<i64: 33, 32>}, {pipeline_mode = #tpu.pipeline_mode<synchronous>, transform_indices = @transform_4, window_bounds = array<i64: 1, 32>}, {pipeline_mode = #tpu.pipeline_mode<synchronous>, transform_indices = @transform_5, window_bounds = array<i64: 32, 32>}, {pipeline_mode = #tpu.pipeline_mode<synchronous>, transform_indices = @transform_6, window_bounds = array<i64: 32, 32>}, {transform_indices = @transform_7, window_bounds = array<i64: 8, 32>}]} {
    %c0 = arith.constant 0 : index
    %c0_0 = arith.constant 0 : index
    %0 = vector.load %arg3[%c0, %c0_0] : memref<64x33xbf16, #tpu.memory_space<vmem>>, vector<64x33xbf16>
    %c0_1 = arith.constant 0 : index
    %c0_2 = arith.constant 0 : index
    %1 = vector.load %arg2[%c0_1, %c0_2] : memref<64x33xbf16, #tpu.memory_space<vmem>>, vector<64x33xbf16>
    %2 = arith.mulf %1, %0 : vector<64x33xbf16>
    %c0_3 = arith.constant 0 : index
    %c0_4 = arith.constant 0 : index
    %3 = vector.load %arg4[%c0_3, %c0_4] : memref<33x32xbf16, #tpu.memory_space<vmem>>, vector<33x32xbf16>
    %cst = arith.constant dense<0.000000e+00> : vector<64x32xf32>
    %4 = tpu.matmul %2, %3, %cst {dimension_numbers = #tpu.dot_dimension_numbers<[1], [0], [0], [1], [0, 0, 1, 1], [], []>} : vector<64x33xbf16>, vector<33x32xbf16>, vector<64x32xf32> -> vector<64x32xf32>
    %cst_5 = arith.constant 0.000000e+00 : f32
    %5 = vector.broadcast %cst_5 : f32 to vector<64x32xf32>
    %6 = arith.cmpf ogt, %4, %5 : vector<64x32xf32>
    %cst_6 = arith.constant 2.000000e-01 : f32
    %7 = vector.broadcast %cst_6 : f32 to vector<64x32xf32>
    %8 = arith.mulf %7, %4 : vector<64x32xf32>
    %9 = arith.select %6, %4, %8 : vector<64x32xi1>, vector<64x32xf32>
    %c0_7 = arith.constant 0 : index
    %c0_8 = arith.constant 0 : index
    %10 = vector.load %arg5[%c0_7, %c0_8] : memref<1x32xf32, #tpu.memory_space<vmem>>, vector<1x32xf32>
    %11 = vector.broadcast %10 : vector<1x32xf32> to vector<64x32xf32>
    %12 = arith.mulf %9, %11 : vector<64x32xf32>
    %cst_9 = arith.constant dense<0.000000e+00> : vector<64xf32>
    %13 = vector.multi_reduction <add>, %12, %cst_9 [1] : vector<64x32xf32> to vector<64xf32>
    %14 = vector.shape_cast %13 : vector<64xf32> to vector<64x1xf32>
    %15 = vector.shape_cast %14 : vector<64x1xf32> to vector<8x8x1xf32>
    %cst_10 = arith.constant dense<0xFF800000> : vector<8x1xf32>
    %16 = vector.multi_reduction <maximumf>, %15, %cst_10 [1] : vector<8x8x1xf32> to vector<8x1xf32>
    %17 = vector.shape_cast %16 : vector<8x1xf32> to vector<8x1x1xf32>
    %18 = vector.broadcast %17 : vector<8x1x1xf32> to vector<8x8x1xf32>
    %19 = arith.subf %15, %18 : vector<8x8x1xf32>
    %20 = math.exp %19 : vector<8x8x1xf32>
    %21 = vector.shape_cast %20 : vector<8x8x1xf32> to vector<64x1xf32>
    %22 = vector.extract_strided_slice %0 {offsets = [0, 0], sizes = [64, 32], strides = [1, 1]} : vector<64x33xbf16> to vector<64x32xbf16>
    %23 = arith.extf %22 : vector<64x32xbf16> to vector<64x32xf32>
    %24 = vector.broadcast %21 : vector<64x1xf32> to vector<64x32xf32>
    %25 = arith.mulf %24, %23 : vector<64x32xf32>
    %26 = vector.shape_cast %25 : vector<64x32xf32> to vector<8x8x32xf32>
    %cst_11 = arith.constant dense<0.000000e+00> : vector<8x32xf32>
    %27 = vector.multi_reduction <add>, %26, %cst_11 [1] : vector<8x8x32xf32> to vector<8x32xf32>
    %cst_12 = arith.constant dense<0.000000e+00> : vector<8x1xf32>
    %28 = vector.multi_reduction <add>, %20, %cst_12 [1] : vector<8x8x1xf32> to vector<8x1xf32>
    %29 = tpu.reciprocal %28 {approx = true} : vector<8x1xf32> -> vector<8x1xf32>
    %30 = vector.broadcast %29 : vector<8x1xf32> to vector<8x32xf32>
    %31 = arith.mulf %27, %30 : vector<8x32xf32>
    %c0_13 = arith.constant 0 : index
    %c0_14 = arith.constant 0 : index
    %32 = vector.load %arg1[%c0_13, %c0_14] : memref<8x32xbf16, #tpu.memory_space<vmem>>, vector<8x32xbf16>
    %c0_15 = arith.constant 0 : index
    %c0_16 = arith.constant 0 : index
    %33 = vector.load %arg6[%c0_15, %c0_16] : memref<32x32xbf16, #tpu.memory_space<vmem>>, vector<32x32xbf16>
    %cst_17 = arith.constant dense<0.000000e+00> : vector<8x32xf32>
    %34 = tpu.matmul %32, %33, %cst_17 {dimension_numbers = #tpu.dot_dimension_numbers<[1], [0], [0], [1], [0, 0, 1, 1], [], []>} : vector<8x32xbf16>, vector<32x32xbf16>, vector<8x32xf32> -> vector<8x32xf32>
    %35 = arith.truncf %31 : vector<8x32xf32> to vector<8x32xbf16>
    %c0_18 = arith.constant 0 : index
    %c0_19 = arith.constant 0 : index
    %36 = vector.load %arg7[%c0_18, %c0_19] : memref<32x32xbf16, #tpu.memory_space<vmem>>, vector<32x32xbf16>
    %cst_20 = arith.constant dense<0.000000e+00> : vector<8x32xf32>
    %37 = tpu.matmul %35, %36, %cst_20 {dimension_numbers = #tpu.dot_dimension_numbers<[1], [0], [0], [1], [0, 0, 1, 1], [], []>} : vector<8x32xbf16>, vector<32x32xbf16>, vector<8x32xf32> -> vector<8x32xf32>
    %38 = arith.addf %34, %37 : vector<8x32xf32>
    %cst_21 = arith.constant 0.000000e+00 : f32
    %39 = vector.broadcast %cst_21 : f32 to vector<8x32xf32>
    %40 = arith.maximumf %38, %39 : vector<8x32xf32>
    %41 = arith.truncf %40 : vector<8x32xf32> to vector<8x32xbf16>
    %c0_22 = arith.constant 0 : index
    %c0_23 = arith.constant 0 : index
    %42 = vector.load %arg8[%c0_22, %c0_23] : memref<8x32xbf16, #tpu.memory_space<vmem>>, vector<8x32xbf16>
    tpu.vector_store %arg8[%c0_22, %c0_23], %41 {strides = array<i32>} : memref<8x32xbf16, #tpu.memory_space<vmem>>, vector<8x32xbf16>,
    return
  }
  func.func @transform_0(%arg0: i32) -> (i32, i32) {
    %c0_i32 = arith.constant 0 : i32
    %c0_i32_0 = arith.constant 0 : i32
    return %arg0, %c0_i32 : i32, i32
  }
  func.func @transform_1(%arg0: i32) -> (i32, i32) {
    %c0_i32 = arith.constant 0 : i32
    %c0_i32_0 = arith.constant 0 : i32
    return %arg0, %c0_i32 : i32, i32
  }
  func.func @transform_2(%arg0: i32) -> (i32, i32) {
    %c0_i32 = arith.constant 0 : i32
    %c0_i32_0 = arith.constant 0 : i32
    return %arg0, %c0_i32 : i32, i32
  }
  func.func @transform_3(%arg0: i32) -> (i32, i32) {
    %c0_i32 = arith.constant 0 : i32
    %c0_i32_0 = arith.constant 0 : i32
    %c0_i32_1 = arith.constant 0 : i32
    return %c0_i32, %c0_i32_0 : i32, i32
  }
  func.func @transform_4(%arg0: i32) -> (i32, i32) {
    %c0_i32 = arith.constant 0 : i32
    %c0_i32_0 = arith.constant 0 : i32
    %c0_i32_1 = arith.constant 0 : i32
    return %c0_i32, %c0_i32_0 : i32, i32
  }
  func.func @transform_5(%arg0: i32) -> (i32, i32) {
    %c0_i32 = arith.constant 0 : i32
    %c0_i32_0 = arith.constant 0 : i32
    %c0_i32_1 = arith.constant 0 : i32
    return %c0_i32, %c0_i32_0 : i32, i32
  }
  func.func @transform_6(%arg0: i32) -> (i32, i32) {
    %c0_i32 = arith.constant 0 : i32
    %c0_i32_0 = arith.constant 0 : i32
    %c0_i32_1 = arith.constant 0 : i32
    return %c0_i32, %c0_i32_0 : i32, i32
  }
  func.func @transform_7(%arg0: i32) -> (i32, i32) {
    %c0_i32 = arith.constant 0 : i32
    %c0_i32_0 = arith.constant 0 : i32
    return %arg0, %c0_i32 : i32, i32
  }
}

</mosaic_0001>

<bundles_post_ra>
// kernel: tpu_custom_call.1
= control target key start
LH: loop header
LB: loop body
LE: loop exit
PB: predicated region body
PF: predicated region fallthrough
CT: control target
= control target key end

     0   :  { %12 = vsyncpa [#allocation3], 0  ;;  %s1378_s0 = inlined_call_operand.vmem [shape: bf16[16,32], index: 0, kind: input, shape index: {}]   ;;  %s1379_s1 = inlined_call_operand.vmem [shape: bf16[128,33], index: 1, kind: input, shape index: {}]   ;;  %s1380_s2 = inlined_call_operand.vmem [shape: bf16[128,33], index: 2, kind: input, shape index: {}]   ;;  %s1381_s3 = inlined_call_operand.vmem [shape: bf16[33,32], index: 3, kind: input, shape index: {}]   ;;  %s1382_s4 = inlined_call_operand.vmem [shape: f32[1,32], index: 4, kind: input, shape index: {}]   ;;  %s1383_s5 = inlined_call_operand.vmem [shape: bf16[32,32], index: 5, kind: input, shape index: {}]   ;;  %s1384_s6 = inlined_call_operand.vmem [shape: bf16[32,32], index: 6, kind: input, shape index: {}]   ;;  %s1385_s7 = inlined_call_operand.hbm [shape: bf16[16,32], index: 7, kind: output, shape index: {}]  }
   0x1   :  { %14 = vsyncpa [#allocation3 + $0x1], 0  ;;  %s1168_s24 = smov 0   ;;  %s1170_s25 = smov 0  }
   0x2   :  { %s1172_s26 = smov 0   ;;  %s1174_s27 = smov 0  }
   0x3 LB: > { %s1189_s28 = sadd.s32 4294967295, %s1125_s27   ;;  %s899_s29 = sadd.s32 4294967294, %s1125_s27   ;;  %s1125_s27 = sphi %s1174_s27, %s1391_s27   ;;  %s1121_s26 = sphi %s1172_s26, %s1390_s26   ;;  %s1117_s25 = sphi %s1170_s25, %s1389_s25   ;;  %s1113_s24 = sphi %s1168_s24, %s1388_s24  }
   0x4   : > { %s1193_s30 = sadd.s32 1, %s1125_s27   ;;  %s189_s8 = sadd.s32 1, %s1121_s26 }
   0x5   : > { %s186_s9 = ssub.s32 %s1125_s27, %s1193_s30  ;;  %p199_p0 = scmp.ne.s32.totalorder %s1121_s26, %s1117_s25 }
   0x6   : > { %p187_p1 = scmp.eq.s32.totalorder %s186_s9, 0  ;;  %p200_p2 = scmp.eq.s32.totalorder %s1189_s28, 1 }
   0x7   : > { %p205_p3 = scmp.ne.s32.totalorder %s1117_s25, %s1113_s24  ;;  %p206_p4 = scmp.eq.s32.totalorder %s899_s29, 1 }
   0x8   : > { %s1204_s10 = scalar_select %p187_p1, %s1121_s26, %s189_s8  }
   0x9   : > { %p1206_p5 = por %p200_p2, %p199_p0  ;;  %p1210_p6 = por %p206_p4, %p205_p3 }
   0xa   : > { %p902_p7 = scmp.ge.s32.totalorder %s1125_s27, 1  ;;  %p261_p8 = scmp.lt.s32.totalorder %s1125_s27, 3 }
   0xc   : > { %p262_p9 = pnand %p902_p7, %p261_p8 }
   0xd   : > { %s905_s15 = sshll.u32 (!%p262_p9), %s1189_s28, 3  ;;  %p302_p11 = scmp.lt.s32.totalorder (!%p262_p9), %s1189_s28, 1 }
   0xe   : > { %265 = sbr.rel (%p262_p9) target bundleno = 509 (0x1fd), region = 48  ;;  %p307_p10 = scmp.lt.s32.totalorder (!%p262_p9), %s905_s15, 15 }
   0xf   : > { %s299_s14 = sand.u32 (!%p262_p9), 1, %s1117_s25   ;;  %s1083_s13 = scalar_lea.hbm (!%p262_p9), %s1385_s7, 8 }
  0x10   : > { %s801_s23 = scalar_lea.sflag (!%p262_p9), [#allocation3], %s299_s14 }
  0x13   : > { %v367_v0 = vld [vmem:[%s1381_s3 + $0x10] sm:$0x1]  ;;  %vm396_vm0 = vcmask 1040384   ;;  %v1127_v2 = vmov 0   ;;  %s1393_s15 = smov (!%p307_p10, %s905_s15), 15  ;;  %v944_v6 = vld [vmem:[%s1381_s3 + $0x8] sm:$0xff] }
  0x14   : > { %v377_v1 = vunpack.c.l.b16 %v367_v0  ;;  %v398_v3 = vsel %vm396_vm0, 65535, %v1127_v2  ;;  %s906_s16 = sshll.u32 %s1393_s15, 2  ;;  %v943_v19 = vld [vmem:[%s1381_s3] sm:$0xff]  ;;  %vm383_vm1 = vcmask 269312   ;;  %vm467_vm3 = vcmask 261120  }
  0x15   : > { %s1226_s21 = scalar_lea.vmem %s1379_s1, %s906_s16  ;;  %s316_s29 = scalar_lea.vmem %s1380_s2, %s906_s16  ;;  %v1030_v45 = vld [vmem:[%s1382_s4] ss:$0 sm:$0xff]  ;;  %vm725_vm11 = vcmask 1041409   ;;  %vm727_vm12 = vcmask 1042434   ;;  %vm729_vm13 = vcmask 1043459   ;;  %vm731_vm14 = vcmask 1044484  }
  0x16   : > { %v380_v4 = vpack.c.b16 %v377_v1, %v377_v1  ;;  %v1231_v7 = vld [vmem:[%s316_s29] sm:$0xff]   ;;  %v1234_v9 = vld [vmem:[%s316_s29 + $0x10] sm:$0xff]   ;;  %v1254_v26 = vld [vmem:[%s316_s29 + $0x8] sm:$0xff]   ;;  %s1298_s15 = scalar_select %p302_p11, %s1189_s28, 1  ;;  %vm733_vm15 = vcmask 1045509   ;;  %vm735_vm0 = vcmask 1046534  }
  0x17   : > { %v966_v8 = vld [vmem:[%s1226_s21] sm:$0xff]   ;;  %v951_v10 = vunpack.c.l.bf16 %v1231_v7  ;;  %v952_v11 = vunpack.c.h.bf16 %v1231_v7  ;;  %v985_v14 = vld [vmem:[%s1226_s21 + $0x10] sm:$0xff]   ;;  %v959_v15 = vunpack.c.l.bf16 %v1234_v9  ;;  %v960_v16 = vunpack.c.h.bf16 %v1234_v9  ;;  %v984_v27 = vld [vmem:[%s1226_s21 + $0x8] sm:$0xff]   ;;  %s940_s16 = sshll.u32 %s1189_s28, 2 }
  0x18   : > { %v400_v5 = vand.u32 %v398_v3, %v380_v4  ;;  %v967_v12 = vunpack.c.l.bf16 %v966_v8  ;;  %v968_v13 = vunpack.c.h.bf16 %v966_v8  ;;  %v975_v17 = vunpack.c.l.bf16 %v985_v14  ;;  %v1257_v28 = vld [vmem:[%s316_s29 + $0x18] sm:$0xff]   ;;  %s904_s18 = sshll.u32 %s1298_s15, 2  ;;  %v948_v7 = vld [vmem:[%s1384_s6 + $0x8] sm:$0xff]  ;;  %s903_s15 = sshll.u32 %s299_s14, 2 }
  0x19   : > { %v976_v18 = vunpack.c.h.bf16 %v985_v14  ;;  %v986_v29 = vld [vmem:[%s1226_s21 + $0x18] sm:$0xff]   ;;  %v955_v30 = vunpack.c.l.bf16 %v1254_v26  ;;  %v956_v31 = vunpack.c.h.bf16 %v1254_v26  ;;  %v971_v32 = vunpack.c.l.bf16 %v984_v27  ;;  %s305_s8 = scalar_lea.vmem %s1378_s0, %s904_s18  ;;  %761 = vmatpush.bf16.msra.mxu1 %v948_v7  ;;  %s811_s19 = scalar_lea.hbm %s1385_s7, %s940_s16 }
  0x1a   : > { %407 = vmatpush.bf16.msra.mxu0 %v400_v5  ;;  %987 = vmatpush.bf16.msra.mxu3 %v400_v5  ;;  %v351_v20 = vmul.f32 %v967_v12, %v951_v10  ;;  %v352_v21 = vmul.f32 %v968_v13, %v952_v11  ;;  %v355_v22 = vmul.f32 %v975_v17, %v959_v15  ;;  %v972_v33 = vunpack.c.h.bf16 %v984_v27  ;;  %s301_s20 = scalar_lea.vmem [#allocation2], %s903_s15  ;;  %s815_s22 = sshll.u32 %s811_s19, 4  ;;  %s816_s22 = int_to_ptr.hbm [resolvable:$true] %s815_s22 }
  0x1b   : > { %v356_v23 = vmul.f32 %v976_v18, %v960_v16  ;;  %v963_v34 = vunpack.c.l.bf16 %v1257_v28  ;;  %v964_v35 = vunpack.c.h.bf16 %v1257_v28  ;;  %v979_v36 = vunpack.c.l.bf16 %v986_v29  ;;  %s813_s21 = sshll.u32 %s301_s20, 4  ;;  %s1077_s29 = sshra.s32 %s816_s22, 4  ;;  %s814_s21 = int_to_ptr.vmem [resolvable:$true] %s813_s21  ;;  %s1078_s29 = int_to_ptr.hbm [resolvable:$true] %s1077_s29 }
  0x1c   : > { %v359_v24 = vpack.c.bf16 %v352_v21, %v351_v20  ;;  %v980_v37 = vunpack.c.h.bf16 %v986_v29  ;;  %v353_v38 = vmul.f32 %v971_v32, %v955_v30  ;;  %v354_v39 = vmul.f32 %v972_v33, %v956_v31  ;;  %s1079_s28 = scalar_lea.hbm %s1078_s29, 4  ;;  %p1084_p1 = scmp.lt.s32.totalorder %s1078_s29, %s1385_s7 }
  0x1d   : > { %v361_v25 = vpack.c.bf16 %v356_v23, %v355_v22  ;;  %v357_v40 = vmul.f32 %v979_v36, %v963_v34  ;;  %p1080_p12 = scmp.ne.s32.totalorder %s1078_s29, %s1079_s28  ;;  %p1085_p2 = scmp.lt.s32.totalorder %s1083_s13, %s1079_s28 }
  0x1e   : > { %408 = vmatpush.bf16.msra.mxu0 %v944_v6  ;;  %988 = vmatpush.bf16.msra.mxu3 %v944_v6  ;;  %v358_v41 = vmul.f32 %v980_v37, %v964_v35  ;;  %v360_v42 = vpack.c.bf16 %v354_v39, %v353_v38 }
  0x1f   : > { %p1081_p13 = pnand %p1080_p12, %p1206_p5  ;;  %p1086_p3 = por %p1085_p2, %p1084_p1 }
  0x20   : > { %v362_v43 = vpack.c.bf16 %v358_v41, %v357_v40 }
  0x21   : > { %p1082_p0 = pneg %p1081_p13 }
  0x22   : > { %409 = vmatpush.bf16.msra.mxu0 %v943_v19  ;;  %989 = vmatpush.bf16.msra.mxu3 %v943_v19 }
  0x23   : > { %p1087_p4 = pnand %p1086_p3, %p1082_p0 }
  0x25   : > { %917 = vmatmul.msk.bf16.vlgmr.msra.gmra.mxu0 %vm383_vm1, %v359_v24  ;;  %919 = vmatmul.msk.bf16.vlgmr.msra.gmra.mxu3 %vm383_vm1, %v361_v25 }
  0x35   : > { %918 = vmatmul.msk.bf16.gmra.mxu0 %vm383_vm1, %v360_v42  ;;  %920 = vmatmul.msk.bf16.gmra.mxu3 %vm383_vm1, %v362_v43  ;;  %vm737_vm1 = vcmask 1047559  }
  0xa2   : > { %v411_v44 = vpop.f32.mrf.mxu0 }
  0xa3   : > { %vm431_vm2 = vcmp.gt.f32.partialorder %v411_v44, 0.0  ;;  %v439_v46 = vmul.f32 0.2, %v411_v44 }
  0xa5   : > { %v447_v47 = vsel %vm431_vm2, %v411_v44, %v439_v46  ;;  %vm798_vm2 = vcmask 257024  }
  0xa6   : > { %v459_v48 = vmul.f32 %v1030_v45, %v447_v47 }
  0xa8   : > { %v421_v49 = vpop.f32.mrf.mxu3  ;;  %v468_v50 = vsel %vm467_vm3, %v459_v48, 0.0 }
  0xa9   : > { %vm435_vm4 = vcmp.gt.f32.partialorder %v421_v49, 0.0  ;;  %v443_v51 = vmul.f32 0.2, %v421_v49  ;;  %469 = vadd.xlane.f32.xlu0 %v468_v50 }
  0xaa   : > { %v413_v52 = vpop.f32.mrf.mxu0 }
  0xab   : > { %vm432_vm5 = vcmp.gt.f32.partialorder %v413_v52, 0.0  ;;  %v440_v53 = vmul.f32 0.2, %v413_v52  ;;  %v451_v54 = vsel %vm435_vm4, %v421_v49, %v443_v51 }
  0xac   : > { %v463_v55 = vmul.f32 %v1030_v45, %v451_v54 }
  0xad   : > { %v448_v56 = vsel %vm432_vm5, %v413_v52, %v440_v53 }
  0xae   : > { %v480_v57 = vsel %vm467_vm3, %v463_v55, 0.0  ;;  %v460_v58 = vmul.f32 %v1030_v45, %v448_v56 }
  0xaf   : > { %481 = vadd.xlane.f32.xlu2 %v480_v57 }
  0xb0   : > { %v423_v59 = vpop.f32.mrf.mxu3  ;;  %v471_v60 = vsel %vm467_vm3, %v460_v58, 0.0 }
  0xb1   : > { %vm436_vm6 = vcmp.gt.f32.partialorder %v423_v59, 0.0  ;;  %v444_v61 = vmul.f32 0.2, %v423_v59  ;;  %472 = vadd.xlane.f32.xlu0 %v471_v60 }
  0xb2   : > { %v416_v62 = vpop.f32.mrf.mxu0 }
  0xb3   : > { %vm433_vm7 = vcmp.gt.f32.partialorder %v416_v62, 0.0  ;;  %v441_v63 = vmul.f32 0.2, %v416_v62  ;;  %v452_v0 = vsel %vm436_vm6, %v423_v59, %v444_v61 }
  0xb4   : > { %v464_v1 = vmul.f32 %v1030_v45, %v452_v0 }
  0xb5   : > { %v449_v2 = vsel %vm433_vm7, %v416_v62, %v441_v63 }
  0xb6   : > { %v483_v3 = vsel %vm467_vm3, %v464_v1, 0.0  ;;  %v461_v4 = vmul.f32 %v1030_v45, %v449_v2 }
  0xb7   : > { %484 = vadd.xlane.f32.xlu2 %v483_v3 }
  0xb8   : > { %v426_v5 = vpop.f32.mrf.mxu3  ;;  %v474_v6 = vsel %vm467_vm3, %v461_v4, 0.0 }
  0xb9   : > { %vm437_vm8 = vcmp.gt.f32.partialorder %v426_v5, 0.0  ;;  %v445_v8 = vmul.f32 0.2, %v426_v5  ;;  %475 = vadd.xlane.f32.xlu1 %v474_v6 }
  0xba   : > { %v418_v12 = vpop.f32.mrf.mxu0 }
  0xbb   : > { %vm434_vm9 = vcmp.gt.f32.partialorder %v418_v12, 0.0  ;;  %v442_v13 = vmul.f32 0.2, %v418_v12  ;;  %v453_v14 = vsel %vm437_vm8, %v426_v5, %v445_v8 }
  0xbc   : > { %v465_v17 = vmul.f32 %v1030_v45, %v453_v14 }
  0xbd   : > { %v450_v18 = vsel %vm434_vm9, %v418_v12, %v442_v13 }
  0xbe   : > { %v486_v19 = vsel %vm467_vm3, %v465_v17, 0.0  ;;  %v462_v20 = vmul.f32 %v1030_v45, %v450_v18 }
  0xbf   : > { %487 = vadd.xlane.f32.xlu0 %v486_v19 }
  0xc0   : > { %v428_v21 = vpop.f32.mrf.mxu3  ;;  %v477_v22 = vsel %vm467_vm3, %v462_v20, 0.0 }
  0xc1   : > { %vm438_vm10 = vcmp.gt.f32.partialorder %v428_v21, 0.0  ;;  %v446_v23 = vmul.f32 0.2, %v428_v21  ;;  %478 = vadd.xlane.f32.xlu1 %v477_v22 }
  0xc3   : > { %v454_v24 = vsel %vm438_vm10, %v428_v21, %v446_v23 }
  0xc4   : > { %v466_v25 = vmul.f32 %v1030_v45, %v454_v24 }
  0xc6   : > { %v489_v27 = vsel %vm467_vm3, %v466_v25, 0.0 }
  0xc9   : > { %490 = vadd.xlane.f32.xlu1 %v489_v27 }
 0x11c   : > { %v470_v29 = vpop.xlane.xlu0 %469 }
 0x11d   : > { %v492_v32 = vrot.slane %v470_v29, 4 }
 0x11f   : > { %v493_v33 = vmax.f32 %v470_v29, %v492_v32 }
 0x121   : > { %v494_v36 = vrot.slane %v493_v33, 2 }
 0x122   : > { %v482_v37 = vpop.xlane.xlu2 %481 }
 0x123   : > { %v495_v38 = vmax.f32 %v493_v33, %v494_v36  ;;  %v516_v39 = vrot.slane %v482_v37, 4 }
 0x124   : > { %v473_v40 = vpop.xlane.xlu0 %472 }
 0x125   : > { %v496_v41 = vrot.slane %v495_v38, 1  ;;  %v517_v42 = vmax.f32 %v482_v37, %v516_v39  ;;  %v498_v43 = vrot.slane %v473_v40, 4 }
 0x127   : > { %v497_v44 = vmax.f32 %v495_v38, %v496_v41  ;;  %v518_v46 = vrot.slane %v517_v42, 2  ;;  %v499_v47 = vmax.f32 %v473_v40, %v498_v43 }
 0x129   : > { %v540_v48 = vsub.f32 %v470_v29, %v497_v44  ;;  %v519_v49 = vmax.f32 %v517_v42, %v518_v46  ;;  %v500_v45 = vrot.slane %v499_v47, 2 }
 0x12a   : > { %v485_v50 = vpop.xlane.xlu2 %484 }
 0x12b   : > { %v548_v51 = vmul.f32 1.442695, %v540_v48  ;;  %v520_v52 = vrot.slane %v519_v49, 1  ;;  %v501_v53 = vmax.f32 %v499_v47, %v500_v45  ;;  %v522_v54 = vrot.slane %v485_v50, 4 }
 0x12c   : > { %v476_v55 = vpop.xlane.xlu1 %475 }
 0x12d   : > { %1031 = vpow2.f32 %v548_v51  ;;  %v521_v56 = vmax.f32 %v519_v49, %v520_v52  ;;  %v502_v57 = vrot.slane %v501_v53, 1  ;;  %v523_v58 = vmax.f32 %v485_v50, %v522_v54  ;;  %v946_v52 = vld [vmem:[%s1383_s5 + $0x8] sm:$0xff] }
 0x12e   : > { %v504_v59 = vrot.slane %v476_v55, 4  ;;  %789 = vmatpush.bf16.msra.mxu2 %v946_v52 }
 0x12f   : > { %v544_v60 = vsub.f32 %v482_v37, %v521_v56  ;;  %v503_v61 = vmax.f32 %v501_v53, %v502_v57  ;;  %v524_v62 = vrot.slane %v523_v58, 2 }
 0x130   : > { %v505_v63 = vmax.f32 %v476_v55, %v504_v59  ;;  %v945_v59 = vld [vmem:[%s1383_s5] sm:$0xff] }
 0x131   : > { %v556_v0 = vmul.f32 1.442695, %v544_v60  ;;  %v541_v1 = vsub.f32 %v473_v40, %v503_v61  ;;  %v525_v2 = vmax.f32 %v523_v58, %v524_v62 }
 0x132   : > { %v506_v3 = vrot.slane %v505_v63, 2  ;;  %v1285_v4 = vpop.xlane.xlu0 %487  ;;  %790 = vmatpush.bf16.msra.mxu2 %v945_v59 }
 0x133   : > { %v1032_v5 = vpop.eup %1031  ;;  %1033 = vpow2.f32 %v556_v0  ;;  %v550_v6 = vmul.f32 1.442695, %v541_v1  ;;  %v526_v8 = vrot.slane %v525_v2, 1  ;;  %v528_v12 = vrot.slane %v1285_v4, 4  ;;  %v947_v1 = vld [vmem:[%s1384_s6] sm:$0xff] }
 0x134   : > { %v564_v13 = vmul.f32 %v1032_v5, %v951_v10  ;;  %v628_v14 = vrot.slane %v1032_v5, 4  ;;  %v507_v17 = vmax.f32 %v505_v63, %v506_v3  ;;  %v1290_v18 = vpop.xlane.xlu1 %478  ;;  %762 = vmatpush.bf16.msra.mxu1 %v947_v1 }
 0x135   : > { %1035 = vpow2.f32 %v550_v6  ;;  %v527_v19 = vmax.f32 %v525_v2, %v526_v8  ;;  %v529_v20 = vmax.f32 %v1285_v4, %v528_v12  ;;  %v510_v21 = vrot.slane %v1290_v18, 4  ;;  %v692_v12 = vld [vmem:[%s305_s8] sm:$0xf] }
 0x136   : > { %v629_v22 = vadd.f32 %v1032_v5, %v628_v14  ;;  %v508_v23 = vrot.slane %v507_v17, 1  ;;  %v572_v10 = vsel %vm467_vm3, %v564_v13, 0.0  ;;  %938 = vmatmul.msk.bf16.vlgmr.msra.gmra.mxu2 %vm467_vm3, %v692_v12 }
 0x137   : > { %v545_v24 = vsub.f32 %v485_v50, %v527_v19  ;;  %v530_v25 = vrot.slane %v529_v20, 2  ;;  %v511_v27 = vmax.f32 %v1290_v18, %v510_v21  ;;  %v573_v44 = vrot.slane %v572_v10, 4 }
 0x138   : > { %v509_v29 = vmax.f32 %v507_v17, %v508_v23  ;;  %v630_v33 = vrot.slane %v629_v22, 2 }
 0x139   : > { %v1034_v32 = vpop.eup %1033  ;;  %v558_v36 = vmul.f32 1.442695, %v545_v24  ;;  %v531_v37 = vmax.f32 %v529_v20, %v530_v25  ;;  %v512_v38 = vrot.slane %v511_v27, 2 }
 0x13a   : > { %v542_v39 = vsub.f32 %v476_v55, %v509_v29  ;;  %v652_v41 = vrot.slane %v1034_v32, 4  ;;  %v631_v47 = vadd.f32 %v630_v33, %v629_v22  ;;  %v568_v62 = vmul.f32 %v1034_v32, %v959_v15 }
 0x13b   : > { %v1036_v40 = vpop.eup %1035  ;;  %1037 = vpow2.f32 %v558_v36  ;;  %v532_v42 = vrot.slane %v531_v37, 1  ;;  %v513_v43 = vmax.f32 %v511_v27, %v512_v38 }
 0x13c   : > { %v565_v46 = vmul.f32 %v1036_v40, %v952_v11  ;;  %v634_v48 = vrot.slane %v1036_v40, 4  ;;  %v552_v49 = vmul.f32 1.442695, %v542_v39  ;;  %v1302_v45 = vpop.xlane.xlu1 %490  ;;  %v653_v53 = vadd.f32 %v1034_v32, %v652_v41 }
 0x13d   : > { %v533_v51 = vmax.f32 %v531_v37, %v532_v42  ;;  %v514_v55 = vrot.slane %v513_v43, 1  ;;  %v574_v11 = vadd.f32 %v573_v44, %v572_v10  ;;  %v534_v58 = vrot.slane %v1302_v45, 4 }
 0x13e   : > { %v579_v50 = vsel %vm467_vm3, %v565_v46, 0.0  ;;  %v635_v54 = vadd.f32 %v1036_v40, %v634_v48  ;;  %1039 = vpow2.f32 %v552_v49  ;;  %v632_v61 = vrot.slane %v631_v47, 1 }
 0x13f   : > { %v580_v56 = vrot.slane %v579_v50, 4  ;;  %v546_v57 = vsub.f32 %v1285_v4, %v533_v51  ;;  %v515_v0 = vmax.f32 %v513_v43, %v514_v55  ;;  %v654_v3 = vrot.slane %v653_v53, 2 }
 0x140   : > { %v636_v63 = vrot.slane %v635_v54, 2  ;;  %v535_v6 = vmax.f32 %v1302_v45, %v534_v58  ;;  %v575_v8 = vrot.slane %v574_v11, 2  ;;  %v633_v14 = vadd.f32 %v632_v61, %v631_v47 }
 0x141   : > { %v1038_v60 = vpop.eup %1037  ;;  %v560_v2 = vmul.f32 1.442695, %v546_v57  ;;  %v543_v5 = vsub.f32 %v1290_v18, %v515_v0  ;;  %v581_v15 = vadd.f32 %v580_v56, %v579_v50  ;;  %v600_v17 = vsel %vm467_vm3, %v568_v62, 0.0 }
 0x142   : > { %v658_v4 = vrot.slane %v1038_v60, 4  ;;  %v637_v19 = vadd.f32 %v636_v63, %v635_v54  ;;  %v569_v21 = vmul.f32 %v1038_v60, %v960_v16  ;;  %v536_v23 = vrot.slane %v535_v6, 2 }
 0x143   : > { %1041 = vpow2.f32 %v560_v2  ;;  %v554_v20 = vmul.f32 1.442695, %v543_v5  ;;  %v655_v24 = vadd.f32 %v654_v3, %v653_v53  ;;  %v582_v27 = vrot.slane %v581_v15, 2 }
 0x144   : > { %v1040_v13 = vpop.eup %1039  ;;  %v659_v25 = vadd.f32 %v1038_v60, %v658_v4  ;;  %v537_v32 = vmax.f32 %v535_v6, %v536_v23  ;;  %v576_v33 = vadd.f32 %v575_v8, %v574_v11  ;;  %v601_v36 = vrot.slane %v600_v17, 4 }
 0x145   : > { %v566_v18 = vmul.f32 %v1040_v13, %v955_v30  ;;  %v640_v22 = vrot.slane %v1040_v13, 4  ;;  %1043 = vpow2.f32 %v554_v20  ;;  %v638_v37 = vrot.slane %v637_v19, 1 }
 0x146   : > { %1045 = vrcp.f32 %v633_v14  ;;  %v607_v30 = vsel %vm467_vm3, %v569_v21, 0.0  ;;  %v538_v39 = vrot.slane %v537_v32, 1  ;;  %v660_v40 = vrot.slane %v659_v25, 2 }
 0x147   : > { %v586_v10 = vsel %vm467_vm3, %v566_v18, 0.0  ;;  %v641_v29 = vadd.f32 %v1040_v13, %v640_v22  ;;  %v656_v44 = vrot.slane %v655_v24, 1  ;;  %v583_v46 = vadd.f32 %v582_v27, %v581_v15 }
 0x148   : > { %v587_v9 = vrot.slane %v586_v10, 4  ;;  %v539_v48 = vmax.f32 %v537_v32, %v538_v39  ;;  %v639_v50 = vadd.f32 %v638_v37, %v637_v19  ;;  %v608_v51 = vrot.slane %v607_v30, 4 }
 0x149   : > { %v1042_v16 = vpop.eup %1041  ;;  %v642_v38 = vrot.slane %v641_v29, 2  ;;  %v661_v56 = vadd.f32 %v660_v40, %v659_v25  ;;  %v577_v8 = vrot.slane %v576_v33, 1  ;;  %v584_v15 = vrot.slane %v583_v46, 1 }
 0x14a   : > { %v588_v41 = vadd.f32 %v587_v9, %v586_v10  ;;  %v570_v42 = vmul.f32 %v1042_v16, %v963_v34  ;;  %v664_v43 = vrot.slane %v1042_v16, 4  ;;  %v547_v11 = vsub.f32 %v1302_v45, %v539_v48 }
 0x14b   : > { %v643_v47 = vadd.f32 %v642_v38, %v641_v29  ;;  %v1044_v49 = vpop.eup %1043  ;;  %v602_v34 = vadd.f32 %v601_v36, %v600_v17  ;;  %1047 = vrcp.f32 %v639_v50  ;;  %v609_v2 = vadd.f32 %v608_v51, %v607_v30 }
 0x14c   : > { %v589_v52 = vrot.slane %v588_v41, 2  ;;  %v665_v53 = vadd.f32 %v1042_v16, %v664_v43  ;;  %v567_v55 = vmul.f32 %v1044_v49, %v956_v31  ;;  %v646_v7 = vrot.slane %v1044_v49, 4  ;;  %v1046_v59 = vpop.eup %1045 }
 0x14d   : > { %v644_v54 = vrot.slane %v643_v47, 1  ;;  %v614_v58 = vsel %vm467_vm3, %v570_v42, 0.0  ;;  %v562_v63 = vmul.f32 1.442695, %v547_v11  ;;  %v603_v4 = vrot.slane %v602_v34, 2 }
 0x14e   : > { %v666_v57 = vrot.slane %v665_v53, 2  ;;  %v593_v61 = vsel %vm467_vm3, %v567_v55, 0.0  ;;  %v647_v62 = vadd.f32 %v1044_v49, %v646_v7  ;;  %v590_v1 = vadd.f32 %v589_v52, %v588_v41 }
 0x14f   : > { %v645_v60 = vadd.f32 %v644_v54, %v643_v47  ;;  %v594_v0 = vrot.slane %v593_v61, 4  ;;  %v615_v31 = vrot.slane %v614_v58, 4  ;;  %v662_v5 = vrot.slane %v661_v56, 1 }
 0x150   : > { %v648_v26 = vrot.slane %v647_v62, 2  ;;  %v667_v3 = vadd.f32 %v666_v57, %v665_v53  ;;  %v591_v12 = vrot.slane %v590_v1, 1  ;;  %v610_v14 = vrot.slane %v609_v2, 2 }
 0x151   : > { %1049 = vrcp.f32 %v645_v60  ;;  %v595_v45 = vadd.f32 %v594_v0, %v593_v61  ;;  %v657_v17 = vadd.f32 %v656_v44, %v655_v24  ;;  %v616_v20 = vadd.f32 %v615_v31, %v614_v58  ;;  %v1048_v21 = vpop.eup %1047 }
 0x152   : > { %1051 = vpow2.f32 %v562_v63  ;;  %v649_v6 = vadd.f32 %v648_v26, %v647_v62  ;;  %v604_v22 = vadd.f32 %v603_v4, %v602_v34  ;;  %v668_v23 = vrot.slane %v667_v3, 1 }
 0x153   : > { %v596_v13 = vrot.slane %v595_v45, 2  ;;  %v578_v10 = vadd.f32 %v577_v8, %v576_v33  ;;  %v663_v29 = vadd.f32 %v662_v5, %v661_v56  ;;  %v585_v36 = vadd.f32 %v584_v15, %v583_v46 }
 0x154   : > { %v650_v19 = vrot.slane %v649_v6, 1  ;;  %v592_v37 = vadd.f32 %v591_v12, %v590_v1  ;;  %v611_v9 = vadd.f32 %v610_v14, %v609_v2  ;;  %1053 = vrcp.f32 %v657_v17 }
 0x155   : > { %v597_v18 = vadd.f32 %v596_v13, %v595_v45  ;;  %v617_v30 = vrot.slane %v616_v20, 2  ;;  %v605_v39 = vrot.slane %v604_v22, 1  ;;  %v669_v40 = vadd.f32 %v668_v23, %v667_v3 }
 0x156   : > { %v651_v27 = vadd.f32 %v650_v19, %v649_v6  ;;  %v685_v41 = vmul.f32 %v1048_v21, %v585_v36  ;;  %v684_v46 = vmul.f32 %v1046_v59, %v578_v10  ;;  %v612_v48 = vrot.slane %v611_v9, 1 }
 0x157   : > { %v1050_v25 = vpop.eup %1049  ;;  %v598_v38 = vrot.slane %v597_v18, 1  ;;  %v618_v49 = vadd.f32 %v617_v30, %v616_v20  ;;  %v606_v53 = vadd.f32 %v605_v39, %v604_v22 }
 0x158   : > { %v1052_v32 = vpop.eup %1051  ;;  %1055 = vrcp.f32 %v651_v27  ;;  %v686_v33 = vmul.f32 %v1050_v25, %v592_v37  ;;  %v697_v56 = vpack.c.bf16 %v684_v46, %v684_v46  ;;  %v613_v59 = vadd.f32 %v612_v48, %v611_v9 }
 0x159   : > { %v571_v16 = vmul.f32 %v1052_v32, %v964_v35  ;;  %v670_v24 = vrot.slane %v1052_v32, 4  ;;  %1057 = vrcp.f32 %v663_v29  ;;  %v599_v51 = vadd.f32 %v598_v38, %v597_v18 }
 0x15a   : > { %v1054_v50 = vpop.eup %1053  ;;  %1059 = vrcp.f32 %v669_v40  ;;  %v698_v35 = vpack.c.bf16 %v685_v41, %v685_v41  ;;  %v699_v55 = vpack.c.bf16 %v686_v33, %v686_v33  ;;  %v619_v34 = vrot.slane %v618_v49, 1 }
 0x15b   : > { %v671_v42 = vadd.f32 %v1052_v32, %v670_v24  ;;  %v621_v43 = vsel %vm467_vm3, %v571_v16, 0.0  ;;  %v688_v60 = vmul.f32 %v1054_v50, %v606_v53  ;;  %v717_v31 = vunpack.c.l.b16 %v697_v56 }
 0x15c   : > { %v622_v44 = vrot.slane %v621_v43, 4  ;;  %v718_v63 = vunpack.c.l.b16 %v698_v35  ;;  %v719_v1 = vunpack.c.l.b16 %v699_v55  ;;  %v620_v45 = vadd.f32 %v619_v34, %v618_v49 }
 0x15d   : > { %v672_v47 = vrot.slane %v671_v42, 2  ;;  %v701_v4 = vpack.c.bf16 %v688_v60, %v688_v60 }
 0x15e   : > { %v623_v28 = vadd.f32 %v622_v44, %v621_v43  ;;  %v1056_v52 = vpop.eup %1055  ;;  %v726_v6 = vsel %vm725_vm11, %v718_v63, %v717_v31 }
 0x15f   : > { %v673_v54 = vadd.f32 %v672_v47, %v671_v42  ;;  %v687_v11 = vmul.f32 %v1056_v52, %v599_v51  ;;  %v1058_v57 = vpop.eup %1057  ;;  %v728_v15 = vsel %vm727_vm12, %v719_v1, %v726_v6  ;;  %v721_v14 = vunpack.c.l.b16 %v701_v4 }
 0x160   : > { %v624_v7 = vrot.slane %v623_v28, 2  ;;  %v1060_v2 = vpop.eup %1059  ;;  %v689_v26 = vmul.f32 %v1058_v57, %v613_v59 }
 0x161   : > { %v674_v58 = vrot.slane %v673_v54, 1  ;;  %v700_v62 = vpack.c.bf16 %v687_v11, %v687_v11  ;;  %v690_v8 = vmul.f32 %v1060_v2, %v620_v45 }
 0x162   : > { %v625_v61 = vadd.f32 %v624_v7, %v623_v28  ;;  %v702_v12 = vpack.c.bf16 %v689_v26, %v689_v26 }
 0x163   : > { %v675_v0 = vadd.f32 %v674_v58, %v673_v54  ;;  %v720_v3 = vunpack.c.l.b16 %v700_v62  ;;  %v703_v20 = vpack.c.bf16 %v690_v8, %v690_v8 }
 0x164   : > { %v626_v5 = vrot.slane %v625_v61, 1  ;;  %v722_v22 = vunpack.c.l.b16 %v702_v12 }
 0x165   : > { %1061 = vrcp.f32 %v675_v0  ;;  %v730_v13 = vsel %vm729_vm13, %v720_v3, %v728_v15  ;;  %v723_v27 = vunpack.c.l.b16 %v703_v20 }
 0x166   : > { %v627_v17 = vadd.f32 %v626_v5, %v625_v61  ;;  %v732_v21 = vsel %vm731_vm14, %v721_v14, %v730_v13 }
 0x167   : > { %v734_v25 = vsel %vm733_vm15, %v722_v22, %v732_v21 }
 0x168   : > { %v736_v29 = vsel %vm735_vm0, %v723_v27, %v734_v25 }
 0x16b   : > { %v1062_v19 = vpop.eup %1061 }
 0x16c   : > { %v691_v18 = vmul.f32 %v1062_v19, %v627_v17 }
 0x16e   : > { %v704_v23 = vpack.c.bf16 %v691_v18, %v691_v18 }
 0x170   : > { %v724_v10 = vunpack.c.l.b16 %v704_v23 }
 0x172   : > { %v738_v32 = vsel %vm737_vm1, %v724_v10, %v736_v29 }
 0x173   : > { %v739_v36 = vpack.c.b16 %v738_v32, %v738_v32 }
 0x175   : > { %929 = vmatmul.msk.bf16.vlgmr.msra.gmra.mxu1 %vm467_vm3, %v739_v36 }
 0x1b9   : > { %v792_v37 = vpop.f32.mrf.mxu2 }
 0x1c1   : > { %v794_v9 = vpop.f32.mrf.mxu2 }
 0x1f2   : > { %v764_v16 = vpop.f32.mrf.mxu1 }
 0x1f3   : > { %v793_v24 = vadd.f32 %v792_v37, %v764_v16 }
 0x1f5   : > { %v796_v30 = vmax.f32 %v793_v24, 0.0 }
 0x1f7   : > { %v797_v38 = vpack.c.bf16 %v796_v30, %v796_v30 }
 0x1f9   : > { %799 = vst.msk [vmem:[%s301_s20] sm:$0xf] %vm798_vm2, %v797_v38 }
 0x1fa   : > { %v766_v39 = vpop.f32.mrf.mxu1 }
 0x1fb   : > { %1090 = shalt.err (!%p1087_p4)
}
 0x1fc   : > { %990 = dma.vmem_to_hbm [thread:$0]  (%p1206_p5), %s814_s21, 64, %s816_s22, %s801_s23  }
 0x1fd PF: > { %p996_p7 = scmp.ge.s32.totalorder %s1125_s27, 2  ;;  %s827_s14 = sand.u32 1, %s1113_s24  }
 0x1fe   : > { %s828_s17 = scalar_lea.sflag [#allocation3], %s827_s14 }
 0x1ff   : > { %p993_p8 = pnand %p996_p7, %p1210_p6 }
 0x201   : > { %p994_p9 = pneg %p993_p8 }
 0x203   : > { %1108 = dma.done.wait (%p994_p9), %s828_s17, 64  }
 0x204   : > { %1110 = vsyncadd (%p994_p9), %s828_s17, 4294967232  ;;  %p17_p10 = scmp.ge.s32.totalorder %s1193_s30, 4   ;;  %s1388_s24 = smov %s1117_s25 }
 0x205   : > { %s1389_s25 = smov %s1121_s26  ;;  %s1390_s26 = smov %s1204_s10 }
 0x206   : > { %s1391_s27 = smov %s1193_s30  ;;  %19 = sbr.rel (!%p17_p10) target bundleno = 3 (0x3), region = 89 }
 0x20b   :  { %834 = vsyncpa [#allocation3], 1 }
 0x20c   :  { %836 = vsyncpa [#allocation3 + $0x1], 1 }

</bundles_post_ra>
